<compile_context>
chip_gen: v7x
topology: tpu7x:2x2x1
jax: 0.10.0
libtpu: 0.0.40
codegen_flags: <defaults>
</compile_context>

<pallas_src>
import functools
import math

import jax
import jax.numpy as jnp
from jax.experimental import pallas as pl
from jax.experimental.pallas import tpu as pltpu

LN_EPS = 1e-5     # torch.nn.LayerNorm default
OUT_PAD = 128     # lane-dense combined output width: [logits | value | zero pad]


# ---------------------------------------------------------------------------
# Kernel
# ---------------------------------------------------------------------------
def _fused_kernel(x_ref, w1_ref, w2a_ref, w2c_ref, w3_ref, vec_ref, b3_ref,
                  out_ref, *, hidden_dim, mxu_dtype):
    """Both heads, fused: (Linear -> LayerNorm -> ReLU) x2 -> Linear.

    vec_ref rows (f32, width 2H; cols [:H]=actor, [H:]=critic):
        0=b1, 1=gamma1, 2=beta1, 3=b2, 4=gamma2, 5=beta2, 6-7=pad.
    w1 = [aw1 | cw1]  ([S, 2H]);  w3 = vstack(aw3_pad, cw3_pad) ([2H, OUT_PAD])
    with actor columns [0, action_dim) and critic column action_dim.
    """
    H = hidden_dim
    x = x_ref[...].astype(mxu_dtype)
    vec = vec_ref[...]                                   # f32 [8, 2H]

    def ln_relu(h, g, be):
        # single-pass LayerNorm stats in f32, clamped variance, affine + ReLU
        mu = jnp.mean(h, axis=-1, keepdims=True)
        ms = jnp.mean(h * h, axis=-1, keepdims=True)
        inv = jax.lax.rsqrt(jnp.maximum(ms - mu * mu, 0.0) + LN_EPS)
        return jnp.maximum((h - mu) * inv * g + be, 0.0)

    # Layer 1, both heads in one MXU push: [TB, S] @ [S, 2H]
    h1 = jnp.dot(x, w1_ref[...], preferred_element_type=jnp.float32) + vec[0:1, :]

    # Per-head LayerNorm (over each head's own H features) + ReLU
    ha = ln_relu(h1[:, :H], vec[1:2, :H], vec[2:3, :H])
    hc = ln_relu(h1[:, H:], vec[1:2, H:], vec[2:3, H:])

    # Layer 2 stays per-head (block-diagonal fusion would double FLOPs)
    ha = jnp.dot(ha.astype(mxu_dtype), w2a_ref[...],
                 preferred_element_type=jnp.float32) + vec[3:4, :H]
    hc = jnp.dot(hc.astype(mxu_dtype), w2c_ref[...],
                 preferred_element_type=jnp.float32) + vec[3:4, H:]
    ha = ln_relu(ha, vec[4:5, :H], vec[5:6, :H])
    hc = ln_relu(hc, vec[4:5, H:], vec[5:6, H:])

    # Layer 3, both heads in one MXU push: [TB, 2H] @ [2H, OUT_PAD].
    # Column-disjoint w3 padding => logits|value|0 come out directly.
    hcat = jnp.concatenate([ha, hc], axis=-1).astype(mxu_dtype)
    out = jnp.dot(hcat, w3_ref[...], preferred_element_type=jnp.float32) + b3_ref[...]
    out_ref[...] = out.astype(out_ref.dtype)


# ---------------------------------------------------------------------------
# Wrapper
# ---------------------------------------------------------------------------
def _round_up(n, m):
    return ((n + m - 1) // m) * m


def actor_critic_forward(x, params, action_dim, *, block_b=512,
                         vmem_limit_bytes=None):
    """Equivalent of ActorCritic.forward: returns (logits [B, action_dim], value [B, 1]).

    Weights are used in whatever dtype they are stored in (see
    cast_params_for_mxu) -- no per-call casting.
    """
    w1, w2a, w2c, w3, vec, b3 = params
    B, state_dim = x.shape
    H2 = w1.shape[1]
    H = H2 // 2
    out_pad = w3.shape[1]
    mxu_dtype = w1.dtype

    # Batch tile: sublane-aligned, capped at block_b; prefer >=2 grid steps so
    # the "parallel" batch axis shards across both TensorCores on v7x and the
    # x/out tiles actually pipeline.
    Bp8 = _round_up(B, 8)
    tb = max(8, min(_round_up(block_b, 8), Bp8))
    if Bp8 // tb < 2 and Bp8 > 8:
        tb = max(8, _round_up(pl.cdiv(Bp8, 2), 8))
    Bp = _round_up(B, tb)
    if Bp != B:
        x = jnp.pad(x, ((0, Bp - B), (0, 0)))

    if vmem_limit_bytes is None:
        wbytes = jnp.dtype(mxu_dtype).itemsize
        weights = (state_dim * H2 + 2 * H * H + H2 * out_pad) * wbytes  # single-buffered
        vecs = (8 * H2 + out_pad) * 4
        io = 2 * tb * (state_dim + out_pad) * 4            # double-buffered x/out tiles
        inter = 8 * tb * max(H2, out_pad) * 4              # f32 LN/activation temporaries
        est = weights + vecs + io + inter
        vmem_limit_bytes = int(min(64 << 20, max(32 << 20, 2 * est)))

    # Constant operands: same block every grid step -> single pipeline buffer.
    def const2d(shape):
        return pl.BlockSpec(shape, lambda i: (0, 0), pipeline_mode=pl.Buffered(1))

    grid = (Bp // tb,)
    out = pl.pallas_call(
        functools.partial(_fused_kernel, hidden_dim=H, mxu_dtype=mxu_dtype),
        out_shape=jax.ShapeDtypeStruct((Bp, out_pad), jnp.float32),
        grid=grid,
        in_specs=[
            pl.BlockSpec((tb, state_dim), lambda i: (i, 0)),  # x tiles (pipelined)
            const2d((state_dim, H2)),                         # fused layer-1 weight
            const2d((H, H)),                                  # actor layer-2 weight
            const2d((H, H)),                                  # critic layer-2 weight
            const2d((H2, out_pad)),                           # fused layer-3 weight (padded)
            const2d((8, H2)),                                 # b/gamma/beta pack (f32)
            const2d((1, out_pad)),                            # combined output bias (f32)
        ],
        out_specs=pl.BlockSpec((tb, out_pad), lambda i: (i, 0)),
        compiler_params=pltpu.CompilerParams(
            dimension_semantics=("parallel",),                # 2 TCs on v7x
            vmem_limit_bytes=vmem_limit_bytes),
    )(x, w1, w2a, w2c, w3, vec, b3)

    logits = out[:B, :action_dim]
    value = out[:B, action_dim:action_dim + 1]
    return logits, value


# ---------------------------------------------------------------------------
# Parameter construction / packing (mirrors ActorCritic.__init__):
#   Linear: orthogonal init, gain sqrt(2); biases zero.
#   LayerNorm: weight ones, bias zeros (PyTorch defaults).
# ---------------------------------------------------------------------------
def _orthogonal(key, in_dim, out_dim, gain):
    # torch weight is [out_dim, in_dim]; kernel wants [in_dim, out_dim].
    w = jax.nn.initializers.orthogonal(scale=gain)(key, (out_dim, in_dim), jnp.float32)
    return jnp.transpose(w)


def cast_params_for_mxu(params, mxu_dtype):
    """One-time cast of the matmul weights to the MXU dtype (LN/bias packs stay
    f32). Do this at param-creation / policy-update time, NOT per forward call."""
    w1, w2a, w2c, w3, vec, b3 = params
    c = lambda w: w.astype(mxu_dtype)
    return (c(w1), c(w2a), c(w2c), c(w3),
            vec.astype(jnp.float32), b3.astype(jnp.float32))


def make_actor_critic_params(key, state_dim, action_dim, hidden_dim,
                             out_pad=OUT_PAD, mxu_dtype=jnp.float32):
    assert action_dim + 1 <= out_pad
    H = hidden_dim
    gain = math.sqrt(2.0)
    ka1, ka2, ka3, kc1, kc2, kc3 = jax.random.split(key, 6)

    aw1 = _orthogonal(ka1, state_dim, H, gain)
    aw2 = _orthogonal(ka2, H, H, gain)
    aw3 = _orthogonal(ka3, H, action_dim, gain)
    cw1 = _orthogonal(kc1, state_dim, H, gain)
    cw2 = _orthogonal(kc2, H, H, gain)
    cw3 = _orthogonal(kc3, H, 1, gain)

    # Fused layer-1 weight: actor cols [:H], critic cols [H:].
    w1 = jnp.concatenate([aw1, cw1], axis=1)                   # [S, 2H]
    # Fused layer-3 weight, column-disjoint: actor -> cols [0, A), critic -> col A.
    w3 = jnp.zeros((2 * H, out_pad), jnp.float32)
    w3 = w3.at[:H, :action_dim].set(aw3)
    w3 = w3.at[H:, action_dim:action_dim + 1].set(cw3)

    zeros = jnp.zeros((2 * H,), jnp.float32)
    ones = jnp.ones((2 * H,), jnp.float32)
    # rows: 0=b1, 1=gamma1, 2=beta1, 3=b2, 4=gamma2, 5=beta2, 6-7=pad
    vec = jnp.stack([zeros, ones, zeros, zeros, ones, zeros, zeros, zeros], 0)
    # Combined final-layer bias (zero at init).
    # TODO(synk): when loading trained torch weights, actor layer-3 bias goes to
    # cols [0, action_dim) and critic bias to col action_dim of b3.
    b3 = jnp.zeros((1, out_pad), jnp.float32)

    return cast_params_for_mxu((w1, aw2, cw2, w3, vec, b3), mxu_dtype)


# ---------------------------------------------------------------------------
# Pure-JAX reference (unpacks the fused params and computes each head exactly
# like the PyTorch module) -- for correctness checking.
# ---------------------------------------------------------------------------
def _ref_forward(x, params, action_dim, hidden_dim):
    w1, w2a, w2c, w3, vec, b3 = (jnp.asarray(p, jnp.float32) for p in params)
    H = hidden_dim

    def ln(h, g, be):
        mu = jnp.mean(h, -1, keepdims=True)
        var = jnp.mean(jnp.square(h - mu), -1, keepdims=True)
        return (h - mu) / jnp.sqrt(var + LN_EPS) * g + be

    def head(w1h, w2h, w3h, b1, g1, be1, b2, g2, be2, b3h):
        h = jnp.maximum(ln(x @ w1h + b1, g1, be1), 0.0)
        h = jnp.maximum(ln(h @ w2h + b2, g2, be2), 0.0)
        return h @ w3h + b3h

    logits = head(w1[:, :H], w2a, w3[:H, :action_dim],
                  vec[0, :H], vec[1, :H], vec[2, :H],
                  vec[3, :H], vec[4, :H], vec[5, :H],
                  b3[0, :action_dim])
    value = head(w1[:, H:], w2c, w3[H:, action_dim:action_dim + 1],
                 vec[0, H:], vec[1, H:], vec[2, H:],
                 vec[3, H:], vec[4, H:], vec[5, H:],
                 b3[0, action_dim:action_dim + 1])
    return logits, value


if __name__ == "__main__":
    # Small shapes consistent with the module's forward: x is [B, state_dim].
    B, state_dim, action_dim, hidden_dim = 8, 16, 4, 32

    key = jax.random.PRNGKey(0)
    kx, kp = jax.random.split(key)
    x = jax.random.normal(kx, (B, state_dim), jnp.float32)

    # f32 MXU path (tight numerical check against the reference).
    params_f32 = make_actor_critic_params(kp, state_dim, action_dim, hidden_dim)
    logits, value = actor_critic_forward(x, params_f32, action_dim)
    logits = jax.block_until_ready(logits)
    value = jax.block_until_ready(value)

    ref_logits, ref_value = _ref_forward(x, params_f32, action_dim, hidden_dim)
    assert logits.shape == (B, action_dim)
    assert value.shape == (B, 1)
    assert jnp.allclose(logits, ref_logits, atol=1e-4, rtol=1e-4)
    assert jnp.allclose(value, ref_value, atol=1e-4, rtol=1e-4)

    # bf16 MXU path: weights pre-cast ONCE here (not per forward call).
    params_bf16 = cast_params_for_mxu(params_f32, jnp.bfloat16)
    bl, bv = actor_critic_forward(x, params_bf16, action_dim)
    bl = jax.block_until_ready(bl)
    bv = jax.block_until_ready(bv)
    assert jnp.allclose(bl, ref_logits, atol=2e-1, rtol=2e-1)
    assert jnp.allclose(bv, ref_value, atol=2e-1, rtol=2e-1)

    # TODO(synk): act()/evaluate() Categorical/Normal sampling, log-prob and
    # entropy stay in host-side JAX — distribution sampling is not a kernel hot path.
    print("KERNEL_OK")
</pallas_src>

<mosaic_0001>
module attributes {stable_mosaic.version = 11 : i64} {
  func.func @_fused_kernel(%arg0: i32, %arg1: memref<8x16xf32, #tpu.memory_space<vmem>>, %arg2: memref<16x64xf32, #tpu.memory_space<vmem>>, %arg3: memref<32x32xf32, #tpu.memory_space<vmem>>, %arg4: memref<32x32xf32, #tpu.memory_space<vmem>>, %arg5: memref<64x128xf32, #tpu.memory_space<vmem>>, %arg6: memref<8x64xf32, #tpu.memory_space<vmem>>, %arg7: memref<1x128xf32, #tpu.memory_space<vmem>>, %arg8: memref<8x128xf32, #tpu.memory_space<vmem>>) attributes {dimension_semantics = [#tpu.dimension_semantics<parallel>], iteration_bounds = array<i64: 1>, scalar_prefetch = 0 : i64, scratch_operands = 0 : i64, tpu.core_type = #tpu.core_type<tc>, window_params = [{transform_indices = @transform_0, window_bounds = array<i64: 8, 16>}, {pipeline_mode = #tpu.pipeline_mode<synchronous>, transform_indices = @transform_1, window_bounds = array<i64: 16, 64>}, {pipeline_mode = #tpu.pipeline_mode<synchronous>, transform_indices = @transform_2, window_bounds = array<i64: 32, 32>}, {pipeline_mode = #tpu.pipeline_mode<synchronous>, transform_indices = @transform_3, window_bounds = array<i64: 32, 32>}, {pipeline_mode = #tpu.pipeline_mode<synchronous>, transform_indices = @transform_4, window_bounds = array<i64: 64, 128>}, {pipeline_mode = #tpu.pipeline_mode<synchronous>, transform_indices = @transform_5, window_bounds = array<i64: 8, 64>}, {pipeline_mode = #tpu.pipeline_mode<synchronous>, transform_indices = @transform_6, window_bounds = array<i64: 1, 128>}, {transform_indices = @transform_7, window_bounds = array<i64: 8, 128>}]} {
    %c0 = arith.constant 0 : index
    %c0_0 = arith.constant 0 : index
    %0 = vector.load %arg1[%c0, %c0_0] : memref<8x16xf32, #tpu.memory_space<vmem>>, vector<8x16xf32>
    %c0_1 = arith.constant 0 : index
    %c0_2 = arith.constant 0 : index
    %1 = vector.load %arg6[%c0_1, %c0_2] : memref<8x64xf32, #tpu.memory_space<vmem>>, vector<8x64xf32>
    %c0_3 = arith.constant 0 : index
    %c0_4 = arith.constant 0 : index
    %2 = vector.load %arg2[%c0_3, %c0_4] : memref<16x64xf32, #tpu.memory_space<vmem>>, vector<16x64xf32>
    %cst = arith.constant dense<0.000000e+00> : vector<8x64xf32>
    %3 = tpu.matmul %0, %2, %cst {dimension_numbers = #tpu.dot_dimension_numbers<[1], [0], [0], [1], [0, 0, 1, 1], [], []>} : vector<8x16xf32>, vector<16x64xf32>, vector<8x64xf32> -> vector<8x64xf32>
    %4 = vector.extract_strided_slice %1 {offsets = [0, 0], sizes = [1, 64], strides = [1, 1]} : vector<8x64xf32> to vector<1x64xf32>
    %5 = vector.broadcast %4 : vector<1x64xf32> to vector<8x64xf32>
    %6 = arith.addf %3, %5 : vector<8x64xf32>
    %7 = vector.extract_strided_slice %6 {offsets = [0, 0], sizes = [8, 32], strides = [1, 1]} : vector<8x64xf32> to vector<8x32xf32>
    %8 = vector.extract_strided_slice %1 {offsets = [1, 0], sizes = [1, 32], strides = [1, 1]} : vector<8x64xf32> to vector<1x32xf32>
    %9 = vector.extract_strided_slice %1 {offsets = [2, 0], sizes = [1, 32], strides = [1, 1]} : vector<8x64xf32> to vector<1x32xf32>
    %cst_5 = arith.constant dense<0.000000e+00> : vector<8xf32>
    %10 = vector.multi_reduction <add>, %7, %cst_5 [1] : vector<8x32xf32> to vector<8xf32>
    %11 = vector.shape_cast %10 : vector<8xf32> to vector<8x1xf32>
    %cst_6 = arith.constant 3.200000e+01 : f32
    %12 = vector.broadcast %cst_6 : f32 to vector<8x1xf32>
    %13 = arith.divf %11, %12 : vector<8x1xf32>
    %14 = arith.mulf %7, %7 : vector<8x32xf32>
    %cst_7 = arith.constant dense<0.000000e+00> : vector<8xf32>
    %15 = vector.multi_reduction <add>, %14, %cst_7 [1] : vector<8x32xf32> to vector<8xf32>
    %16 = vector.shape_cast %15 : vector<8xf32> to vector<8x1xf32>
    %cst_8 = arith.constant 3.200000e+01 : f32
    %17 = vector.broadcast %cst_8 : f32 to vector<8x1xf32>
    %18 = arith.divf %16, %17 : vector<8x1xf32>
    %19 = arith.mulf %13, %13 : vector<8x1xf32>
    %20 = arith.subf %18, %19 : vector<8x1xf32>
    %cst_9 = arith.constant 0.000000e+00 : f32
    %21 = vector.broadcast %cst_9 : f32 to vector<8x1xf32>
    %22 = arith.maximumf %20, %21 : vector<8x1xf32>
    %cst_10 = arith.constant 9.99999974E-6 : f32
    %23 = vector.broadcast %cst_10 : f32 to vector<8x1xf32>
    %24 = arith.addf %22, %23 : vector<8x1xf32>
    %25 = math.rsqrt %24 : vector<8x1xf32>
    %26 = vector.broadcast %13 : vector<8x1xf32> to vector<8x32xf32>
    %27 = arith.subf %7, %26 : vector<8x32xf32>
    %28 = vector.broadcast %25 : vector<8x1xf32> to vector<8x32xf32>
    %29 = arith.mulf %27, %28 : vector<8x32xf32>
    %30 = vector.broadcast %8 : vector<1x32xf32> to vector<8x32xf32>
    %31 = arith.mulf %29, %30 : vector<8x32xf32>
    %32 = vector.broadcast %9 : vector<1x32xf32> to vector<8x32xf32>
    %33 = arith.addf %31, %32 : vector<8x32xf32>
    %cst_11 = arith.constant 0.000000e+00 : f32
    %34 = vector.broadcast %cst_11 : f32 to vector<8x32xf32>
    %35 = arith.maximumf %33, %34 : vector<8x32xf32>
    %36 = vector.extract_strided_slice %6 {offsets = [0, 32], sizes = [8, 32], strides = [1, 1]} : vector<8x64xf32> to vector<8x32xf32>
    %37 = vector.extract_strided_slice %1 {offsets = [1, 32], sizes = [1, 32], strides = [1, 1]} : vector<8x64xf32> to vector<1x32xf32>
    %38 = vector.extract_strided_slice %1 {offsets = [2, 32], sizes = [1, 32], strides = [1, 1]} : vector<8x64xf32> to vector<1x32xf32>
    %cst_12 = arith.constant dense<0.000000e+00> : vector<8xf32>
    %39 = vector.multi_reduction <add>, %36, %cst_12 [1] : vector<8x32xf32> to vector<8xf32>
    %40 = vector.shape_cast %39 : vector<8xf32> to vector<8x1xf32>
    %cst_13 = arith.constant 3.200000e+01 : f32
    %41 = vector.broadcast %cst_13 : f32 to vector<8x1xf32>
    %42 = arith.divf %40, %41 : vector<8x1xf32>
    %43 = arith.mulf %36, %36 : vector<8x32xf32>
    %cst_14 = arith.constant dense<0.000000e+00> : vector<8xf32>
    %44 = vector.multi_reduction <add>, %43, %cst_14 [1] : vector<8x32xf32> to vector<8xf32>
    %45 = vector.shape_cast %44 : vector<8xf32> to vector<8x1xf32>
    %cst_15 = arith.constant 3.200000e+01 : f32
    %46 = vector.broadcast %cst_15 : f32 to vector<8x1xf32>
    %47 = arith.divf %45, %46 : vector<8x1xf32>
    %48 = arith.mulf %42, %42 : vector<8x1xf32>
    %49 = arith.subf %47, %48 : vector<8x1xf32>
    %cst_16 = arith.constant 0.000000e+00 : f32
    %50 = vector.broadcast %cst_16 : f32 to vector<8x1xf32>
    %51 = arith.maximumf %49, %50 : vector<8x1xf32>
    %cst_17 = arith.constant 9.99999974E-6 : f32
    %52 = vector.broadcast %cst_17 : f32 to vector<8x1xf32>
    %53 = arith.addf %51, %52 : vector<8x1xf32>
    %54 = math.rsqrt %53 : vector<8x1xf32>
    %55 = vector.broadcast %42 : vector<8x1xf32> to vector<8x32xf32>
    %56 = arith.subf %36, %55 : vector<8x32xf32>
    %57 = vector.broadcast %54 : vector<8x1xf32> to vector<8x32xf32>
    %58 = arith.mulf %56, %57 : vector<8x32xf32>
    %59 = vector.broadcast %37 : vector<1x32xf32> to vector<8x32xf32>
    %60 = arith.mulf %58, %59 : vector<8x32xf32>
    %61 = vector.broadcast %38 : vector<1x32xf32> to vector<8x32xf32>
    %62 = arith.addf %60, %61 : vector<8x32xf32>
    %cst_18 = arith.constant 0.000000e+00 : f32
    %63 = vector.broadcast %cst_18 : f32 to vector<8x32xf32>
    %64 = arith.maximumf %62, %63 : vector<8x32xf32>
    %c0_19 = arith.constant 0 : index
    %c0_20 = arith.constant 0 : index
    %65 = vector.load %arg3[%c0_19, %c0_20] : memref<32x32xf32, #tpu.memory_space<vmem>>, vector<32x32xf32>
    %cst_21 = arith.constant dense<0.000000e+00> : vector<8x32xf32>
    %66 = tpu.matmul %35, %65, %cst_21 {dimension_numbers = #tpu.dot_dimension_numbers<[1], [0], [0], [1], [0, 0, 1, 1], [], []>} : vector<8x32xf32>, vector<32x32xf32>, vector<8x32xf32> -> vector<8x32xf32>
    %67 = vector.extract_strided_slice %1 {offsets = [3, 0], sizes = [1, 32], strides = [1, 1]} : vector<8x64xf32> to vector<1x32xf32>
    %68 = vector.broadcast %67 : vector<1x32xf32> to vector<8x32xf32>
    %69 = arith.addf %66, %68 : vector<8x32xf32>
    %c0_22 = arith.constant 0 : index
    %c0_23 = arith.constant 0 : index
    %70 = vector.load %arg4[%c0_22, %c0_23] : memref<32x32xf32, #tpu.memory_space<vmem>>, vector<32x32xf32>
    %cst_24 = arith.constant dense<0.000000e+00> : vector<8x32xf32>
    %71 = tpu.matmul %64, %70, %cst_24 {dimension_numbers = #tpu.dot_dimension_numbers<[1], [0], [0], [1], [0, 0, 1, 1], [], []>} : vector<8x32xf32>, vector<32x32xf32>, vector<8x32xf32> -> vector<8x32xf32>
    %72 = vector.extract_strided_slice %1 {offsets = [3, 32], sizes = [1, 32], strides = [1, 1]} : vector<8x64xf32> to vector<1x32xf32>
    %73 = vector.broadcast %72 : vector<1x32xf32> to vector<8x32xf32>
    %74 = arith.addf %71, %73 : vector<8x32xf32>
    %75 = vector.extract_strided_slice %1 {offsets = [4, 0], sizes = [1, 32], strides = [1, 1]} : vector<8x64xf32> to vector<1x32xf32>
    %76 = vector.extract_strided_slice %1 {offsets = [5, 0], sizes = [1, 32], strides = [1, 1]} : vector<8x64xf32> to vector<1x32xf32>
    %cst_25 = arith.constant dense<0.000000e+00> : vector<8xf32>
    %77 = vector.multi_reduction <add>, %69, %cst_25 [1] : vector<8x32xf32> to vector<8xf32>
    %78 = vector.shape_cast %77 : vector<8xf32> to vector<8x1xf32>
    %cst_26 = arith.constant 3.200000e+01 : f32
    %79 = vector.broadcast %cst_26 : f32 to vector<8x1xf32>
    %80 = arith.divf %78, %79 : vector<8x1xf32>
    %81 = arith.mulf %69, %69 : vector<8x32xf32>
    %cst_27 = arith.constant dense<0.000000e+00> : vector<8xf32>
    %82 = vector.multi_reduction <add>, %81, %cst_27 [1] : vector<8x32xf32> to vector<8xf32>
    %83 = vector.shape_cast %82 : vector<8xf32> to vector<8x1xf32>
    %cst_28 = arith.constant 3.200000e+01 : f32
    %84 = vector.broadcast %cst_28 : f32 to vector<8x1xf32>
    %85 = arith.divf %83, %84 : vector<8x1xf32>
    %86 = arith.mulf %80, %80 : vector<8x1xf32>
    %87 = arith.subf %85, %86 : vector<8x1xf32>
    %cst_29 = arith.constant 0.000000e+00 : f32
    %88 = vector.broadcast %cst_29 : f32 to vector<8x1xf32>
    %89 = arith.maximumf %87, %88 : vector<8x1xf32>
    %cst_30 = arith.constant 9.99999974E-6 : f32
    %90 = vector.broadcast %cst_30 : f32 to vector<8x1xf32>
    %91 = arith.addf %89, %90 : vector<8x1xf32>
    %92 = math.rsqrt %91 : vector<8x1xf32>
    %93 = vector.broadcast %80 : vector<8x1xf32> to vector<8x32xf32>
    %94 = arith.subf %69, %93 : vector<8x32xf32>
    %95 = vector.broadcast %92 : vector<8x1xf32> to vector<8x32xf32>
    %96 = arith.mulf %94, %95 : vector<8x32xf32>
    %97 = vector.broadcast %75 : vector<1x32xf32> to vector<8x32xf32>
    %98 = arith.mulf %96, %97 : vector<8x32xf32>
    %99 = vector.broadcast %76 : vector<1x32xf32> to vector<8x32xf32>
    %100 = arith.addf %98, %99 : vector<8x32xf32>
    %cst_31 = arith.constant 0.000000e+00 : f32
    %101 = vector.broadcast %cst_31 : f32 to vector<8x32xf32>
    %102 = arith.maximumf %100, %101 : vector<8x32xf32>
    %103 = vector.extract_strided_slice %1 {offsets = [4, 32], sizes = [1, 32], strides = [1, 1]} : vector<8x64xf32> to vector<1x32xf32>
    %104 = vector.extract_strided_slice %1 {offsets = [5, 32], sizes = [1, 32], strides = [1, 1]} : vector<8x64xf32> to vector<1x32xf32>
    %cst_32 = arith.constant dense<0.000000e+00> : vector<8xf32>
    %105 = vector.multi_reduction <add>, %74, %cst_32 [1] : vector<8x32xf32> to vector<8xf32>
    %106 = vector.shape_cast %105 : vector<8xf32> to vector<8x1xf32>
    %cst_33 = arith.constant 3.200000e+01 : f32
    %107 = vector.broadcast %cst_33 : f32 to vector<8x1xf32>
    %108 = arith.divf %106, %107 : vector<8x1xf32>
    %109 = arith.mulf %74, %74 : vector<8x32xf32>
    %cst_34 = arith.constant dense<0.000000e+00> : vector<8xf32>
    %110 = vector.multi_reduction <add>, %109, %cst_34 [1] : vector<8x32xf32> to vector<8xf32>
    %111 = vector.shape_cast %110 : vector<8xf32> to vector<8x1xf32>
    %cst_35 = arith.constant 3.200000e+01 : f32
    %112 = vector.broadcast %cst_35 : f32 to vector<8x1xf32>
    %113 = arith.divf %111, %112 : vector<8x1xf32>
    %114 = arith.mulf %108, %108 : vector<8x1xf32>
    %115 = arith.subf %113, %114 : vector<8x1xf32>
    %cst_36 = arith.constant 0.000000e+00 : f32
    %116 = vector.broadcast %cst_36 : f32 to vector<8x1xf32>
    %117 = arith.maximumf %115, %116 : vector<8x1xf32>
    %cst_37 = arith.constant 9.99999974E-6 : f32
    %118 = vector.broadcast %cst_37 : f32 to vector<8x1xf32>
    %119 = arith.addf %117, %118 : vector<8x1xf32>
    %120 = math.rsqrt %119 : vector<8x1xf32>
    %121 = vector.broadcast %108 : vector<8x1xf32> to vector<8x32xf32>
    %122 = arith.subf %74, %121 : vector<8x32xf32>
    %123 = vector.broadcast %120 : vector<8x1xf32> to vector<8x32xf32>
    %124 = arith.mulf %122, %123 : vector<8x32xf32>
    %125 = vector.broadcast %103 : vector<1x32xf32> to vector<8x32xf32>
    %126 = arith.mulf %124, %125 : vector<8x32xf32>
    %127 = vector.broadcast %104 : vector<1x32xf32> to vector<8x32xf32>
    %128 = arith.addf %126, %127 : vector<8x32xf32>
    %cst_38 = arith.constant 0.000000e+00 : f32
    %129 = vector.broadcast %cst_38 : f32 to vector<8x32xf32>
    %130 = arith.maximumf %128, %129 : vector<8x32xf32>
    %131 = tpu.concatenate %102, %130 in 1 : vector<8x32xf32>, vector<8x32xf32> -> vector<8x64xf32>
    %c0_39 = arith.constant 0 : index
    %c0_40 = arith.constant 0 : index
    %132 = vector.load %arg5[%c0_39, %c0_40] : memref<64x128xf32, #tpu.memory_space<vmem>>, vector<64x128xf32>
    %cst_41 = arith.constant dense<0.000000e+00> : vector<8x128xf32>
    %133 = tpu.matmul %131, %132, %cst_41 {dimension_numbers = #tpu.dot_dimension_numbers<[1], [0], [0], [1], [0, 0, 1, 1], [], []>} : vector<8x64xf32>, vector<64x128xf32>, vector<8x128xf32> -> vector<8x128xf32>
    %c0_42 = arith.constant 0 : index
    %c0_43 = arith.constant 0 : index
    %134 = vector.load %arg7[%c0_42, %c0_43] : memref<1x128xf32, #tpu.memory_space<vmem>>, vector<1x128xf32>
    %135 = vector.broadcast %134 : vector<1x128xf32> to vector<8x128xf32>
    %136 = arith.addf %133, %135 : vector<8x128xf32>
    %c0_44 = arith.constant 0 : index
    %c0_45 = arith.constant 0 : index
    %137 = vector.load %arg8[%c0_44, %c0_45] : memref<8x128xf32, #tpu.memory_space<vmem>>, vector<8x128xf32>
    tpu.vector_store %arg8[%c0_44, %c0_45], %136 {strides = array<i32>} : memref<8x128xf32, #tpu.memory_space<vmem>>, vector<8x128xf32>,
    return
  }
  func.func @transform_0(%arg0: i32) -> (i32, i32) {
    %c0_i32 = arith.constant 0 : i32
    %c0_i32_0 = arith.constant 0 : i32
    return %arg0, %c0_i32 : i32, i32
  }
  func.func @transform_1(%arg0: i32) -> (i32, i32) {
    %c0_i32 = arith.constant 0 : i32
    %c0_i32_0 = arith.constant 0 : i32
    %c0_i32_1 = arith.constant 0 : i32
    return %c0_i32, %c0_i32_0 : i32, i32
  }
  func.func @transform_2(%arg0: i32) -> (i32, i32) {
    %c0_i32 = arith.constant 0 : i32
    %c0_i32_0 = arith.constant 0 : i32
    %c0_i32_1 = arith.constant 0 : i32
    return %c0_i32, %c0_i32_0 : i32, i32
  }
  func.func @transform_3(%arg0: i32) -> (i32, i32) {
    %c0_i32 = arith.constant 0 : i32
    %c0_i32_0 = arith.constant 0 : i32
    %c0_i32_1 = arith.constant 0 : i32
    return %c0_i32, %c0_i32_0 : i32, i32
  }
  func.func @transform_4(%arg0: i32) -> (i32, i32) {
    %c0_i32 = arith.constant 0 : i32
    %c0_i32_0 = arith.constant 0 : i32
    %c0_i32_1 = arith.constant 0 : i32
    return %c0_i32, %c0_i32_0 : i32, i32
  }
  func.func @transform_5(%arg0: i32) -> (i32, i32) {
    %c0_i32 = arith.constant 0 : i32
    %c0_i32_0 = arith.constant 0 : i32
    %c0_i32_1 = arith.constant 0 : i32
    return %c0_i32, %c0_i32_0 : i32, i32
  }
  func.func @transform_6(%arg0: i32) -> (i32, i32) {
    %c0_i32 = arith.constant 0 : i32
    %c0_i32_0 = arith.constant 0 : i32
    %c0_i32_1 = arith.constant 0 : i32
    return %c0_i32, %c0_i32_0 : i32, i32
  }
  func.func @transform_7(%arg0: i32) -> (i32, i32) {
    %c0_i32 = arith.constant 0 : i32
    %c0_i32_0 = arith.constant 0 : i32
    return %arg0, %c0_i32 : i32, i32
  }
}

</mosaic_0001>

<bundles_post_ra>
// kernel: tpu_custom_call.1
= control target key start
LH: loop header
LB: loop body
LE: loop exit
PB: predicated region body
PF: predicated region fallthrough
CT: control target
= control target key end

     0   :  { %12 = vsyncpa [#allocation3], 0  ;;  %s1022_s0 = inlined_call_operand.hbm [shape: f32[8,16], index: 0, kind: input, shape index: {}]   ;;  %s1023_s1 = inlined_call_operand.hbm [shape: f32[16,64], index: 1, kind: input, shape index: {}]   ;;  %s1024_s2 = inlined_call_operand.hbm [shape: f32[32,32], index: 2, kind: input, shape index: {}]   ;;  %s1025_s3 = inlined_call_operand.hbm [shape: f32[32,32], index: 3, kind: input, shape index: {}]   ;;  %s1026_s4 = inlined_call_operand.hbm [shape: f32[64,128], index: 4, kind: input, shape index: {}]   ;;  %s1027_s5 = inlined_call_operand.vmem [shape: f32[8,64], index: 5, kind: input, shape index: {}]   ;;  %s1028_s6 = inlined_call_operand.vmem [shape: f32[1,128], index: 6, kind: input, shape index: {}]   ;;  %s1029_s7 = inlined_call_operand.hbm [shape: f32[8,128], index: 7, kind: output, shape index: {}]  }
   0x1   :  { %13 = vsyncpa [#allocation6], 0 }
   0x2   :  { %14 = vsyncpa [#allocation9], 0 }
   0x3   :  { %15 = vsyncpa [#allocation4], 0  ;;  %s823_s24 = smov [#allocation5]   ;;  %s683_s28 = scalar_lea.hbm %s1023_s1, 256 }
   0x4   :  { %s31_s25 = sshll.u32 %s823_s24, 4  ;;  %p684_p0 = scmp.ne.s32.totalorder %s1023_s1, %s683_s28  ;;  %s32_s25 = int_to_ptr.vmem [resolvable:$true] %s31_s25 }
   0x5   :  { %p687_p1 = scmp.lt.u32.totalorder %s683_s28, %s1023_s1 }
   0x7   :  { %p689_p2 = pnand %p687_p1, %p684_p0 }
   0x9   :  { %692 = shalt.err (!%p689_p2)
}
   0xa   :  { %s693_s10 = scalar_lea.vmem %s32_s25, 256  ;;  %p698_p4 = scmp.lt.s32.totalorder %s32_s25, %s32_s25 }
   0xb   :  { %p694_p3 = scmp.ne.s32.totalorder %s32_s25, %s693_s10  ;;  %p699_p5 = scmp.lt.s32.totalorder %s693_s10, %s693_s10 }
   0xd   :  { %p700_p6 = por %p699_p5, %p698_p4 }
   0xf   :  { %p701_p7 = pnand %p700_p6, %p694_p3 }
  0x11   :  { %704 = shalt.err (!%p701_p7)
}
  0x12   :  { %s824_s11 = smov 128   ;;  %s825_s12 = smov 8  }
  0x13   :  { %37 = dma.hbm_to_vmem [thread:$0]  %s1023_s1, 256, %s32_s25, [#allocation6], %s824_s11, %s824_s11, %s825_s12  }
  0x14   :  { %s826_s15 = smov [#allocation8]   ;;  %s827_s17 = smov [#allocation2]  }
  0x15   :  { %s55_s16 = sshll.u32 %s826_s15, 4  ;;  %s22_s18 = sshll.u32 %s827_s17, 4  ;;  %s56_s16 = int_to_ptr.vmem [resolvable:$true] %s55_s16  ;;  %s23_s18 = int_to_ptr.vmem [resolvable:$true] %s22_s18 }
  0x16   :  { %s705_s21 = scalar_lea.hbm %s1025_s3, 512 }
  0x17   :  { %p706_p8 = scmp.ne.s32.totalorder %s1025_s3, %s705_s21  ;;  %p709_p9 = scmp.lt.u32.totalorder %s705_s21, %s1025_s3 }
  0x19   :  { %p711_p10 = pnand %p709_p9, %p706_p8 }
  0x1b   :  { %714 = shalt.err (!%p711_p10)
}
  0x1c   :  { %s715_s1 = scalar_lea.vmem %s56_s16, 512  ;;  %p720_p12 = scmp.lt.s32.totalorder %s56_s16, %s56_s16 }
  0x1d   :  { %p716_p11 = scmp.ne.s32.totalorder %s56_s16, %s715_s1  ;;  %p721_p13 = scmp.lt.s32.totalorder %s715_s1, %s715_s1 }
  0x1f   :  { %p722_p0 = por %p721_p13, %p720_p12 }
  0x21   :  { %p723_p1 = pnand %p722_p0, %p716_p11 }
  0x23   :  { %726 = shalt.err (!%p723_p1)
}
  0x24   :  { %61 = dma.hbm_to_vmem [thread:$0]  %s1025_s3, 512, %s56_s16, [#allocation9], %s824_s11, %s824_s11, %s825_s12  }
  0x25   :  { %s727_s30 = scalar_lea.hbm %s1022_s0, 128 }
  0x26   :  { %p728_p2 = scmp.ne.s32.totalorder %s1022_s0, %s727_s30  ;;  %p731_p3 = scmp.lt.u32.totalorder %s727_s30, %s1022_s0 }
  0x28   :  { %p733_p4 = pnand %p731_p3, %p728_p2 }
  0x2a   :  { %736 = shalt.err (!%p733_p4)
}
  0x2b   :  { %s737_s14 = scalar_lea.vmem %s23_s18, 128  ;;  %p742_p6 = scmp.lt.s32.totalorder %s23_s18, %s23_s18 }
  0x2c   :  { %p738_p5 = scmp.ne.s32.totalorder %s23_s18, %s737_s14  ;;  %p743_p7 = scmp.lt.s32.totalorder %s737_s14, %s737_s14 }
  0x2e   :  { %p744_p8 = por %p743_p7, %p742_p6 }
  0x30   :  { %p745_p9 = pnand %p744_p8, %p738_p5 }
  0x32   :  { %748 = shalt.err (!%p745_p9)
}
  0x33   :  { %25 = dma.hbm_to_vmem [thread:$0]  %s1022_s0, 128, %s23_s18, [#allocation3]  }
  0x34   :  { %s828_s16 = smov [#allocation7]   ;;  %s829_s19 = smov [#allocation10]  }
  0x35   :  { %s43_s17 = sshll.u32 %s828_s16, 4  ;;  %s67_s20 = sshll.u32 %s829_s19, 4  ;;  %s44_s17 = int_to_ptr.vmem [resolvable:$true] %s43_s17  ;;  %s68_s20 = int_to_ptr.vmem [resolvable:$true] %s67_s20 }
  0x36   :  { %s749_s23 = scalar_lea.hbm %s1024_s2, 512 }
  0x37   :  { %p750_p10 = scmp.ne.s32.totalorder %s1024_s2, %s749_s23  ;;  %p753_p11 = scmp.lt.u32.totalorder %s749_s23, %s1024_s2 }
  0x39   :  { %p755_p12 = pnand %p753_p11, %p750_p10 }
  0x3b   :  { %758 = shalt.err (!%p755_p12)
}
  0x3c   :  { %s759_s0 = scalar_lea.vmem %s44_s17, 512  ;;  %p764_p0 = scmp.lt.s32.totalorder %s44_s17, %s44_s17 }
  0x3d   :  { %p760_p13 = scmp.ne.s32.totalorder %s44_s17, %s759_s0  ;;  %p765_p1 = scmp.lt.s32.totalorder %s759_s0, %s759_s0 }
  0x3f   :  { %p766_p2 = por %p765_p1, %p764_p0 }
  0x41   :  { %p767_p3 = pnand %p766_p2, %p760_p13 }
  0x43   :  { %770 = shalt.err (!%p767_p3)
}
  0x44   :  { %49 = dma.hbm_to_vmem [thread:$0]  %s1024_s2, 512, %s44_s17, [#allocation6], %s824_s11, %s824_s11, %s825_s12  }
  0x45   :  { %s771_s30 = scalar_lea.hbm %s1026_s4, 1024 }
  0x46   :  { %p772_p4 = scmp.ne.s32.totalorder %s1026_s4, %s771_s30  ;;  %p775_p5 = scmp.lt.u32.totalorder %s771_s30, %s1026_s4 }
  0x48   :  { %p777_p6 = pnand %p775_p5, %p772_p4 }
  0x4a   :  { %780 = shalt.err (!%p777_p6)
}
  0x4b   :  { %s781_s14 = scalar_lea.vmem %s68_s20, 1024  ;;  %p786_p8 = scmp.lt.s32.totalorder %s68_s20, %s68_s20 }
  0x4c   :  { %p782_p7 = scmp.ne.s32.totalorder %s68_s20, %s781_s14  ;;  %p787_p9 = scmp.lt.s32.totalorder %s781_s14, %s781_s14 }
  0x4e   :  { %p788_p10 = por %p787_p9, %p786_p8 }
  0x50   :  { %p789_p11 = pnand %p788_p10, %p782_p7 }
  0x52   :  { %792 = shalt.err (!%p789_p11)
}
  0x53   :  { %73 = dma.hbm_to_vmem [thread:$0]  %s1026_s4, 1024, %s68_s20, [#allocation9], %s824_s11, %s824_s11, %s825_s12  }
  0x54   :  { %815 = dma.done.wait [#allocation3], 128  }
  0x55   :  { %816 = vsyncadd [#allocation3], 4294967168 }
  0x56   :  { %817 = dma.done.wait [#allocation6], 768  }
  0x57   :  { %818 = vsyncadd [#allocation6], 4294966528 }
  0x58   :  { %819 = dma.done.wait [#allocation9], 1536  }
  0x59   :  { %820 = vsyncadd [#allocation9], 4294965760  ;;  %v830_v0 = vmov 0.0|0.0   ;;  %vm831_vm0 = vmmov 0   ;;  %v832_v1 = vmov 0.0   ;;  %v95_v2 = vld [vmem:[#allocation5] sm:$0xff]  ;;  %v97_v6 = vlaneseq }
  0x5a   :  { %635 = vmatprep.subr.bf16.mxu0 %v830_v0  ;;  %591 = vmatprep.mubr.msk.f32.mxu0 %vm831_vm0, %v832_v1  ;;  %v96_v3 = vld [vmem:[#allocation5 + $0x8] sm:$0xff]  ;;  %v93_v5 = vld [vmem:[#allocation2] sm:$0xff]  ;;  %vm101_vm1 = vcmask 130048   ;;  %s833_s12 = smov 96   ;;  %vm175_vm2 = vcmask 261120   ;;  %v230_v21 = vld [vmem:[#allocation7] sm:$0xff] }
  0x5b   :  { %650 = vmatprep.subr.bf16.mxu1 %v830_v0  ;;  %632 = vmatprep.mubr.msk.f32.mxu1 %vm831_vm0, %v832_v1  ;;  %v636_v4 = vpack.c.bf16 %v96_v3, %v95_v2  ;;  %v957_v7 = vshrl.u32 %v97_v6, 7  ;;  %v963_v9 = vld [vmem:[%s1027_s5] sm:$0xff]  ;;  %v232_v24 = vld [vmem:[#allocation7 + $0x10] sm:$0xff]  ;;  %v233_v25 = vld [vmem:[#allocation7 + $0x18] sm:$0xff]  ;;  %s834_s5 = smov 32   ;;  %vm468_vm3 = vcmask 523264  }
  0x5c   :  { %v231_v22 = vld [vmem:[#allocation7 + $0x8] sm:$0xff]  ;;  %v642_v26 = vpack.c.bf16 %v233_v25, %v232_v24  ;;  %v311_v58 = vld [vmem:[#allocation8] sm:$0xff]  ;;  %v313_v2 = vld [vmem:[#allocation8 + $0x10] sm:$0xff]  ;;  %s835_s17 = smov [#allocation11]  }
  0x5d   :  { %637 = vmatpush3.bf16.msra.mxu0 %v636_v4  ;;  %v99_v8 = vsub.s32 0, %v957_v7  ;;  %v639_v23 = vpack.c.bf16 %v231_v22, %v230_v21  ;;  %v195_v43 = vsub.s32 1, %v957_v7  ;;  %v200_v44 = vsub.s32 2, %v957_v7  ;;  %v312_v59 = vld [vmem:[#allocation8 + $0x8] sm:$0xff]  ;;  %v314_v3 = vld [vmem:[#allocation8 + $0x18] sm:$0xff]  ;;  %v453_v24 = vld [vmem:[#allocation10] sm:$0xff] }
  0x5e   :  { %638 = vmatprep.subr.bf16.mxu0 %v830_v0  ;;  %v236_v55 = vsub.s32 3, %v957_v7  ;;  %v645_v62 = vpack.c.bf16 %v312_v59, %v311_v58  ;;  %v648_v4 = vpack.c.bf16 %v314_v3, %v313_v2  ;;  %v417_v21 = vsub.s32 5, %v957_v7  ;;  %v454_v25 = vld [vmem:[#allocation10 + $0x8] sm:$0xff]  ;;  %s549_s19 = sshll.u32 %s835_s17, 4  ;;  %s550_s19 = int_to_ptr.vmem [resolvable:$true] %s549_s19 }
  0x5f   :  { %v100_v10 = vrot.slane %v963_v9, %v99_v8  ;;  %v196_v46 = vrot.slane %v963_v9, %v195_v43  ;;  %v201_v48 = vrot.slane %v963_v9, %v200_v44  ;;  %v563_v3 = vld [vmem:[%s1028_s6] ss:$0 sm:$0xff]  ;;  %s793_s20 = scalar_lea.vmem %s550_s19, 128  ;;  %p798_p13 = scmp.lt.s32.totalorder %s550_s19, %s550_s19 }
  0x60   :  { %592 = vmatmul.mubr.msk.f32.vlgmr.msra.gmra.mrb[0].mxu0 %vm101_vm1, %v93_v5  ;;  %v237_v61 = vrot.slane %v963_v9, %v236_v55  ;;  %v418_v22 = vrot.slane %v963_v9, %v417_v21  ;;  %p794_p12 = scmp.ne.s32.totalorder %s550_s19, %s793_s20  ;;  %p799_p0 = scmp.lt.s32.totalorder %s793_s20, %s793_s20 }
  0x61   :  { %602 = vmatprep.mubr.msk.f32.mxu0 %vm831_vm0, %v832_v1  ;;  %640 = vmatpush3.bf16.msra.mxu0 %v639_v23 }
  0x62   :  { %641 = vmatprep.subr.bf16.mxu0 %v830_v0  ;;  %p800_p1 = por %p799_p0, %p798_p13 }
  0x64   :  { %p801_p2 = pnand %p800_p1, %p794_p12 }
  0x65   :  { %643 = vmatpush3.bf16.msra.mxu0 %v642_v26  ;;  %v455_v26 = vld [vmem:[#allocation10 + $0x10] sm:$0xff] }
  0x66   :  { %644 = vmatprep.subr.bf16.mxu0 %v830_v0 }
 0x133   :  { %v171_v11 = vpop.f32.mrb[0].mxu0 }
 0x134   :  { %v172_v12 = vadd.f32 %v171_v11, %v100_v10  ;;  %v593_v13 = vpop.f32.mrb[1].mxu0 }
 0x136   :  { %205 = vrot.lane.b32.xlu0 %v172_v12, %s833_s12  ;;  %v181_v14 = vmul.f32 %v172_v12, %v172_v12  ;;  %v176_v15 = vsel %vm175_vm2, %v172_v12, 0.0 }
 0x138   :  { %v182_v20 = vsel %vm175_vm2, %v181_v14, 0.0 }
 0x13a   :  { %213 = vrot.lane.b32.xlu0 %v181_v14, %s833_s12 }
 0x159   :  { %177 = vadd.xlane.f32.xlu0 %v176_v15 }
 0x1a8   :  { %v206_v16 = vpop.permute.xlu0 %205 }
 0x1a9   :  { %v208_v17 = vsel %vm175_vm2, %v206_v16, 0.0 }
 0x1aa   :  { %209 = vadd.xlane.f32.xlu1 %v208_v17 }
 0x1ac   :  { %v214_v18 = vpop.permute.xlu0 %213 }
 0x1ad   :  { %v216_v19 = vsel %vm175_vm2, %v214_v18, 0.0 }
 0x1ae   :  { %217 = vadd.xlane.f32.xlu1 %v216_v19  ;;  %v412_v19 = vsub.s32 4, %v957_v7  ;;  %v457_v7 = vld [vmem:[#allocation10 + $0x20] sm:$0xff] }
 0x1b2   :  { %183 = vadd.xlane.f32.xlu1 %v182_v20  ;;  %v413_v20 = vrot.slane %v963_v9, %v412_v19  ;;  %v459_v9 = vld [vmem:[#allocation10 + $0x30] sm:$0xff] }
 0x1e6   :  { %v178_v29 = vpop.xlane.xlu0 %177 }
 0x1e7   :  { %v180_v31 = vmul.f32 0.03125, %v178_v29 }
 0x1e9   :  { %v186_v36 = vmul.f32 %v180_v31, %v180_v31  ;;  %v191_v50 = vsub.f32 %v172_v12, %v180_v31 }
 0x237   :  { %v210_v27 = vpop.xlane.xlu1 %209 }
 0x238   :  { %v211_v28 = vmul.f32 0.03125, %v210_v27  ;;  %v651_v27 = vpack.c.bf16 %v454_v25, %v453_v24 }
 0x23a   :  { %v220_v32 = vmul.f32 %v211_v28, %v211_v28  ;;  %v225_v45 = vsub.f32 %v172_v12, %v211_v28  ;;  %v456_v28 = vld [vmem:[#allocation10 + $0x18] sm:$0xff]  ;;  %652 = vmatpush3.bf16.msra.mxu1 %v651_v27 }
 0x23b   :  { %v218_v30 = vpop.xlane.xlu1 %217  ;;  %v654_v29 = vpack.c.bf16 %v456_v28, %v455_v26  ;;  %653 = vmatprep.subr.bf16.mxu1 %v830_v0 }
 0x23c   :  { %v219_v33 = vmul.f32 0.03125, %v218_v30  ;;  %v458_v30 = vld [vmem:[#allocation10 + $0x28] sm:$0xff] }
 0x23d   :  { %v657_v31 = vpack.c.bf16 %v458_v30, %v457_v7 }
 0x23e   :  { %v221_v34 = vsub.f32 %v219_v33, %v220_v32  ;;  %655 = vmatpush3.bf16.msra.mxu1 %v654_v29  ;;  %v460_v32 = vld [vmem:[#allocation10 + $0x38] sm:$0xff] }
 0x23f   :  { %v184_v35 = vpop.xlane.xlu1 %183  ;;  %656 = vmatprep.subr.bf16.mxu1 %v830_v0  ;;  %v660_v33 = vpack.c.bf16 %v460_v32, %v459_v9 }
 0x240   :  { %v222_v37 = vmax.f32 %v221_v34, 0.0  ;;  %v185_v38 = vmul.f32 0.03125, %v184_v35 }
 0x242   :  { %v223_v39 = vadd.f32 1e-05, %v222_v37  ;;  %v187_v40 = vsub.f32 %v185_v38, %v186_v36  ;;  %658 = vmatpush3.bf16.msra.mxu1 %v657_v31 }
 0x243   :  { %659 = vmatprep.subr.bf16.mxu1 %v830_v0 }
 0x244   :  { %675 = vrsqrt.f32 %v223_v39  ;;  %v188_v41 = vmax.f32 %v187_v40, 0.0 }
 0x246   :  { %v189_v42 = vadd.f32 1e-05, %v188_v41  ;;  %661 = vmatpush3.bf16.msra.mxu1 %v660_v33 }
 0x248   :  { %677 = vrsqrt.f32 %v189_v42 }
 0x24e   :  { %v676_v47 = vpop.eup %675 }
 0x24f   :  { %v226_v49 = vmul.f32 %v676_v47, %v225_v45 }
 0x251   :  { %v227_v51 = vmul.f32 %v226_v49, %v196_v46 }
 0x252   :  { %v678_v52 = vpop.eup %677 }
 0x253   :  { %v228_v53 = vadd.f32 %v227_v51, %v201_v48  ;;  %v192_v54 = vmul.f32 %v678_v52, %v191_v50 }
 0x255   :  { %v229_v56 = vmax.f32 %v228_v53, 0.0  ;;  %v197_v57 = vmul.f32 %v196_v46, %v192_v54 }
 0x257   :  { %316 = vrot.lane.b32.xlu1 %v229_v56, %s833_s12  ;;  %v202_v60 = vadd.f32 %v201_v48, %v197_v57 }
 0x259   :  { %v203_v63 = vmax.f32 %v202_v60, 0.0 }
 0x25b   :  { %603 = vmatmul.mubr.msk.f32.vlgmr.msra.gmra.mrb[2].mxu0 %vm175_vm2, %v203_v63  ;;  %319 = vrot.lane.b32.xlu1 %v237_v61, %s833_s12 }
 0x25c   :  { %646 = vmatpush3.bf16.msra.mxu0 %v645_v62  ;;  %613 = vmatprep.mubr.msk.f32.mxu0 %vm831_vm0, %v832_v1 }
 0x25d   :  { %647 = vmatprep.subr.bf16.mxu0 %v830_v0 }
 0x260   :  { %649 = vmatpush3.bf16.msra.mxu0 %v648_v4 }
 0x2c9   :  { %v317_v5 = vpop.permute.xlu1 %316 }
 0x2ca   :  { %614 = vmatmul.mubr.msk.f32.vlgmr.msra.gmra.mrb[4].mxu0 %vm175_vm2, %v317_v5 }
 0x2cd   :  { %v320_v10 = vpop.permute.xlu1 %319 }
 0x32e   :  { %v307_v6 = vpop.f32.mrb[2].mxu0 }
 0x32f   :  { %v604_v8 = vpop.f32.mrb[3].mxu0  ;;  %v987_v11 = vadd.f32 %v307_v6, %v237_v61 }
 0x331   :  { %v398_v1 = vmul.f32 %v987_v11, %v987_v11  ;;  %v394_v23 = vsel %vm175_vm2, %v987_v11, 0.0 }
 0x333   :  { %v399_v18 = vsel %vm175_vm2, %v398_v1, 0.0 }
 0x39d   :  { %v390_v12 = vpop.f32.mrb[4].mxu0 }
 0x39e   :  { %v391_v13 = vadd.f32 %v390_v12, %v320_v10  ;;  %v615_v14 = vpop.f32.mrb[5].mxu0 }
 0x3a0   :  { %v421_v15 = vsel %vm175_vm2, %v391_v13, 0.0  ;;  %v425_v16 = vmul.f32 %v391_v13, %v391_v13 }
 0x3a1   :  { %422 = vadd.xlane.f32.xlu1 %v421_v15 }
 0x3a2   :  { %v426_v17 = vsel %vm175_vm2, %v425_v16, 0.0 }
 0x3a3   :  { %427 = vadd.xlane.f32.xlu0 %v426_v17 }
 0x3a5   :  { %400 = vadd.xlane.f32.xlu1 %v399_v18 }
 0x3b9   :  { %438 = vrot.lane.b32.xlu0 %v413_v20, %s833_s12 }
 0x3bd   :  { %443 = vrot.lane.b32.xlu0 %v418_v22, %s833_s12 }
 0x3dc   :  { %395 = vadd.xlane.f32.xlu0 %v394_v23 }
 0x42e   :  { %v423_v34 = vpop.xlane.xlu1 %422 }
 0x42f   :  { %v424_v35 = vmul.f32 0.03125, %v423_v34 }
 0x430   :  { %v428_v36 = vpop.xlane.xlu0 %427 }
 0x431   :  { %v430_v37 = vmul.f32 %v424_v35, %v424_v35  ;;  %v429_v38 = vmul.f32 0.03125, %v428_v36  ;;  %v435_v43 = vsub.f32 %v391_v13, %v424_v35 }
 0x432   :  { %v401_v51 = vpop.xlane.xlu1 %400 }
 0x433   :  { %v431_v39 = vsub.f32 %v429_v38, %v430_v37  ;;  %v402_v53 = vmul.f32 0.03125, %v401_v51 }
 0x434   :  { %v439_v42 = vpop.permute.xlu0 %438 }
 0x435   :  { %v432_v40 = vmax.f32 %v431_v39, 0.0 }
 0x437   :  { %v433_v41 = vadd.f32 1e-05, %v432_v40 }
 0x438   :  { %v444_v46 = vpop.permute.xlu0 %443 }
 0x439   :  { %679 = vrsqrt.f32 %v433_v41 }
 0x443   :  { %v680_v44 = vpop.eup %679 }
 0x444   :  { %v436_v45 = vmul.f32 %v680_v44, %v435_v43 }
 0x446   :  { %v441_v47 = vmul.f32 %v439_v42, %v436_v45 }
 0x448   :  { %v446_v48 = vadd.f32 %v444_v46, %v441_v47 }
 0x44a   :  { %v447_v49 = vmax.f32 %v446_v48, 0.0 }
 0x44c   :  { %449 = vrot.lane.b32.xlu1 %v447_v49, %s834_s5 }
 0x469   :  { %v396_v0 = vpop.xlane.xlu0 %395 }
 0x46a   :  { %v397_v50 = vmul.f32 0.03125, %v396_v0 }
 0x46c   :  { %v403_v52 = vmul.f32 %v397_v50, %v397_v50  ;;  %v408_v58 = vsub.f32 %v987_v11, %v397_v50 }
 0x46e   :  { %v404_v54 = vsub.f32 %v402_v53, %v403_v52 }
 0x470   :  { %v405_v55 = vmax.f32 %v404_v54, 0.0 }
 0x472   :  { %v406_v56 = vadd.f32 1e-05, %v405_v55 }
 0x474   :  { %681 = vrsqrt.f32 %v406_v56 }
 0x47e   :  { %v682_v57 = vpop.eup %681 }
 0x47f   :  { %v409_v59 = vmul.f32 %v682_v57, %v408_v58 }
 0x481   :  { %v414_v60 = vmul.f32 %v413_v20, %v409_v59 }
 0x483   :  { %v419_v61 = vadd.f32 %v418_v22, %v414_v60 }
 0x485   :  { %v420_v62 = vmax.f32 %v419_v61, 0.0 }
 0x4be   :  { %v450_v63 = vpop.permute.xlu1 %449 }
 0x4bf   :  { %v452_v2 = vsel %vm175_vm2, %v420_v62, %v450_v63 }
 0x4c0   :  { %633 = vmatmul.mubr.msk.f32.vlgmr.msra.gmra.mrb[0].mxu1 %vm468_vm3, %v452_v2 }
 0x593   :  { %v538_v4 = vpop.f32.mrb[0].mxu1 }
 0x594   :  { %v539_v5 = vadd.f32 %v563_v3, %v538_v4  ;;  %v634_v6 = vpop.f32.mrb[1].mxu1 }
 0x596   :  { %542 = vst [vmem:[#allocation11] sm:$0xff] %v539_v5 }
 0x597   :  { %804 = shalt.err (!%p801_p2)
}
 0x598   :  { %s805_s23 = scalar_lea.hbm %s1029_s7, 128 }
 0x599   :  { %p806_p3 = scmp.ne.s32.totalorder %s1029_s7, %s805_s23  ;;  %p809_p4 = scmp.lt.u32.totalorder %s805_s23, %s1029_s7 }
 0x59b   :  { %p811_p5 = pnand %p809_p4, %p806_p3 }
 0x59d   :  { %814 = shalt.err (!%p811_p5)
}
 0x59e   :  { %552 = dma.vmem_to_hbm [thread:$0]  %s550_s19, 128, %s1029_s7, [#allocation4]  }
 0x59f   :  { %821 = dma.done.wait [#allocation4], 128  }
 0x5a0   :  { %822 = vsyncadd [#allocation4], 4294967168 }
 0x5a1   :  { %556 = vsyncpa [#allocation3], 1 }
 0x5a2   :  { %557 = vsyncpa [#allocation6], 1 }
 0x5a3   :  { %558 = vsyncpa [#allocation9], 1 }
 0x5a4   :  { %559 = vsyncpa [#allocation4], 1 }

</bundles_post_ra>
